<compile_context>
chip_gen: v7x
topology: tpu7x:2x2x1
jax: 0.10.0
libtpu: 0.0.40
codegen_flags: <defaults>
</compile_context>

<pallas_src>
import functools

import jax
import jax.numpy as jnp
from jax.experimental import pallas as pl
from jax.experimental.pallas import tpu as pltpu


def packed_linear_kernel(x_ref, w_ref, b_ref, o_ref):
    # x_ref: (TBp, pack*K)      lane-dense packed batch tile (double-buffered)
    # w_ref: (pack*K, pack*N)   block-diagonal weight, VMEM-resident (const idx)
    # b_ref: (1, pack*N)        tiled bias, VMEM-resident (const idx)
    # o_ref: (TBp, pack*N)      lane-dense packed output tile
    o_ref[...] = (
        jnp.dot(x_ref[...], w_ref[...], preferred_element_type=jnp.float32)
        + b_ref[...]
    ).astype(o_ref.dtype)


@functools.partial(jax.jit, static_argnames=("tbp",))
def linear_pallas(x, weight, bias, *, tbp=512):
    """y = x @ weight.T + bias  (exact nn.Linear semantics).

    x:      (B, in_features)             float32
    weight: (out_features, in_features)  float32  (PyTorch layout, not transposed)
    bias:   (out_features,)              float32
    returns (B, out_features)            float32
    """
    B, K = x.shape
    N = weight.shape[0]

    # Fold `pack` batch rows into the 128-lane axis (pack=64 for N=2).
    pack = max(1, 128 // N)
    lanes = pack * N            # packed output width (128 when N | 128)
    kp = pack * K               # packed input width (640)

    # Only a non-pack-aligned batch pays a pad; aligned batches go straight in.
    Bp = pl.cdiv(B, pack) * pack
    if Bp != B:
        x = jnp.pad(x, ((0, Bp - B), (0, 0)))
    nrows = Bp // pack
    xp = x.reshape(nrows, kp)   # free: (B, K) is row-major contiguous

    # Block-diagonal packed weight: w_packed[b*K + k, b*N + j] = weight[j, k].
    eye = jnp.eye(pack, dtype=weight.dtype)
    w_packed = jnp.einsum("bc,jk->bkcj", eye, weight).reshape(kp, lanes)
    # Tiled packed bias: b_packed[0, b*N + j] = bias[j].
    b_packed = jnp.tile(bias, pack).reshape(1, lanes)

    # Packed-row tile: big enough to amortize per-step overhead, multiple of 8
    # sublanes whenever it actually tiles the array.
    TBp = min(tbp, nrows)
    if TBp < nrows:
        TBp = max(8, (TBp // 8) * 8)
    elif nrows >= 16:
        # Whole batch fits one tile: split in two so v7x megacore gets work on
        # both TensorCores (no-op on single-TC v5e/v6e).
        TBp = ((pl.cdiv(nrows, 2) + 7) // 8) * 8
        TBp = min(TBp, nrows)
    grid_b = pl.cdiv(nrows, TBp)

    out_packed = pl.pallas_call(
        packed_linear_kernel,
        out_shape=jax.ShapeDtypeStruct((nrows, lanes), x.dtype),
        grid=(grid_b,),
        in_specs=[
            # x: tiled over packed batch rows; last dim is the full array dim.
            pl.BlockSpec((TBp, kp), lambda i: (i, 0)),
            # weight: full-array block, constant index -> fetched once, resident.
            pl.BlockSpec((kp, lanes), lambda i: (0, 0)),
            # bias: tiny full-array VMEM block, constant index -> resident.
            pl.BlockSpec((1, lanes), lambda i: (0, 0)),
        ],
        out_specs=pl.BlockSpec((TBp, lanes), lambda i: (i, 0)),
        compiler_params=pltpu.CompilerParams(
            dimension_semantics=("parallel",),
        ),
    )(xp, w_packed, b_packed)

    y = out_packed.reshape(Bp, N)   # free metadata reshape back to (Bp, 2)
    return y if Bp == B else y[:B]


if __name__ == "__main__":
    in_features, out_features = 10, 2

    key = jax.random.PRNGKey(0)
    kw, kb, k1, k2, k3 = jax.random.split(key, 5)

    # Deterministic synthetic parameters (PyTorch Linear shapes).
    weight = jax.random.normal(kw, (out_features, in_features), jnp.float32) * 0.1
    bias = jax.random.normal(kb, (out_features,), jnp.float32) * 0.1

    def ref(xv):
        return xv @ weight.T + bias

    # 1) 64-aligned batch: no pad/slice, single packed tile.
    x1 = jax.random.normal(k1, (192, in_features), jnp.float32)
    y1 = jax.block_until_ready(linear_pallas(x1, weight, bias))
    assert y1.shape == (192, out_features)
    assert jnp.allclose(y1, ref(x1), atol=1e-5, rtol=1e-5)

    # 2) non-aligned small batch: exercises the pad + tail-slice path.
    x2 = jax.random.normal(k2, (20, in_features), jnp.float32)
    y2 = jax.block_until_ready(linear_pallas(x2, weight, bias))
    assert y2.shape == (20, out_features)
    assert jnp.allclose(y2, ref(x2), atol=1e-5, rtol=1e-5)

    # 3) multi-step grid with a ragged (masked) last block:
    #    40 packed rows, tbp=16 -> grid of 3 (16 + 16 + 8-of-16).
    x3 = jax.random.normal(k3, (2560, in_features), jnp.float32)
    y3 = jax.block_until_ready(linear_pallas(x3, weight, bias, tbp=16))
    assert y3.shape == (2560, out_features)
    assert jnp.allclose(y3, ref(x3), atol=1e-5, rtol=1e-5)

    print("KERNEL_OK")
</pallas_src>

<mosaic_0001>
module attributes {stable_mosaic.version = 11 : i64} {
  func.func @packed_linear_kernel(%arg0: i32, %arg1: memref<3x640xf32, #tpu.memory_space<vmem>>, %arg2: memref<640x128xf32, #tpu.memory_space<vmem>>, %arg3: memref<1x128xf32, #tpu.memory_space<vmem>>, %arg4: memref<3x128xf32, #tpu.memory_space<vmem>>) attributes {dimension_semantics = [#tpu.dimension_semantics<parallel>], iteration_bounds = array<i64: 1>, scalar_prefetch = 0 : i64, scratch_operands = 0 : i64, tpu.core_type = #tpu.core_type<tc>, window_params = [{transform_indices = @transform_0, window_bounds = array<i64: 3, 640>}, {pipeline_mode = #tpu.pipeline_mode<synchronous>, transform_indices = @transform_1, window_bounds = array<i64: 640, 128>}, {pipeline_mode = #tpu.pipeline_mode<synchronous>, transform_indices = @transform_2, window_bounds = array<i64: 1, 128>}, {transform_indices = @transform_3, window_bounds = array<i64: 3, 128>}]} {
    %c0 = arith.constant 0 : index
    %c0_0 = arith.constant 0 : index
    %0 = vector.load %arg1[%c0, %c0_0] : memref<3x640xf32, #tpu.memory_space<vmem>>, vector<3x640xf32>
    %c0_1 = arith.constant 0 : index
    %c0_2 = arith.constant 0 : index
    %1 = vector.load %arg2[%c0_1, %c0_2] : memref<640x128xf32, #tpu.memory_space<vmem>>, vector<640x128xf32>
    %cst = arith.constant dense<0.000000e+00> : vector<3x128xf32>
    %2 = tpu.matmul %0, %1, %cst {dimension_numbers = #tpu.dot_dimension_numbers<[1], [0], [0], [1], [0, 0, 1, 1], [], []>} : vector<3x640xf32>, vector<640x128xf32>, vector<3x128xf32> -> vector<3x128xf32>
    %c0_3 = arith.constant 0 : index
    %c0_4 = arith.constant 0 : index
    %3 = vector.load %arg3[%c0_3, %c0_4] : memref<1x128xf32, #tpu.memory_space<vmem>>, vector<1x128xf32>
    %4 = vector.broadcast %3 : vector<1x128xf32> to vector<3x128xf32>
    %5 = arith.addf %2, %4 : vector<3x128xf32>
    %c0_5 = arith.constant 0 : index
    %c0_6 = arith.constant 0 : index
    %6 = vector.load %arg4[%c0_5, %c0_6] : memref<3x128xf32, #tpu.memory_space<vmem>>, vector<3x128xf32>
    tpu.vector_store %arg4[%c0_5, %c0_6], %5 {strides = array<i32>} : memref<3x128xf32, #tpu.memory_space<vmem>>, vector<3x128xf32>,
    return
  }
  func.func @transform_0(%arg0: i32) -> (i32, i32) {
    %c0_i32 = arith.constant 0 : i32
    %c0_i32_0 = arith.constant 0 : i32
    return %arg0, %c0_i32 : i32, i32
  }
  func.func @transform_1(%arg0: i32) -> (i32, i32) {
    %c0_i32 = arith.constant 0 : i32
    %c0_i32_0 = arith.constant 0 : i32
    %c0_i32_1 = arith.constant 0 : i32
    return %c0_i32, %c0_i32_0 : i32, i32
  }
  func.func @transform_2(%arg0: i32) -> (i32, i32) {
    %c0_i32 = arith.constant 0 : i32
    %c0_i32_0 = arith.constant 0 : i32
    %c0_i32_1 = arith.constant 0 : i32
    return %c0_i32, %c0_i32_0 : i32, i32
  }
  func.func @transform_3(%arg0: i32) -> (i32, i32) {
    %c0_i32 = arith.constant 0 : i32
    %c0_i32_0 = arith.constant 0 : i32
    return %arg0, %c0_i32 : i32, i32
  }
}

</mosaic_0001>

<bundles_post_ra>
// kernel: tile.8
= control target key start
LH: loop header
LB: loop body
LE: loop exit
PB: predicated region body
PF: predicated region fallthrough
CT: control target
= control target key end

     0   :  { %s64_s0 = inlined_call_operand.vmem [shape: f32[2], index: 0, kind: input, shape index: {}]   ;;  %s65_s1 = inlined_call_operand.vmem [shape: f32[64,2], index: 1, kind: output, shape index: {}]  }
   0x1   :  { %v4_v0 = vld [vmem:[%s64_s0] ss:$0 sm:$0xff] }
   0x2   :  { %5 = vst [vmem:[%s65_s1] sm:$0xff] %v4_v0  ;;  %20 = vst [vmem:[%s65_s1 + $0x8] sm:$0xff] %v4_v0 }
   0x3   :  { %21 = vst [vmem:[%s65_s1 + $0x10] sm:$0xff] %v4_v0  ;;  %22 = vst [vmem:[%s65_s1 + $0x18] sm:$0xff] %v4_v0 }
   0x4   :  { %23 = vst [vmem:[%s65_s1 + $0x20] sm:$0xff] %v4_v0  ;;  %24 = vst [vmem:[%s65_s1 + $0x28] sm:$0xff] %v4_v0 }
   0x5   :  { %25 = vst [vmem:[%s65_s1 + $0x30] sm:$0xff] %v4_v0  ;;  %26 = vst [vmem:[%s65_s1 + $0x38] sm:$0xff] %v4_v0 }

// kernel: tile.9
= control target key start
LH: loop header
LB: loop body
LE: loop exit
PB: predicated region body
PF: predicated region fallthrough
CT: control target
= control target key end

     0   :  { %s515_s10 = smov 126   ;;  %s516_s11 = smov 122   ;;  %vm3_vm0 = vcmask 15360   ;;  %vm9_vm1 = vcmask 1048560   ;;  %vm21_vm2 = vcmask 1015760   ;;  %vm15_vm3 = vcmask 1032160   ;;  %s783_s0 = inlined_call_operand.vmem [shape: f32[64,2], index: 0, kind: input, shape index: {}]   ;;  %s784_s1 = inlined_call_operand.vmem [shape: f32[1,128], index: 1, kind: output, shape index: {}]  }
   0x1   :  { %v389_v0 = vld [vmem:[%s783_s0 + $0x3f] sm:$0x1]   ;;  %v391_v1 = vld [vmem:[%s783_s0 + $0x3d] sm:$0x1]   ;;  %v390_v2 = vld [vmem:[%s783_s0 + $0x3e] sm:$0x1]  }
   0x2   :  { %7 = vrot.lane.b32.xlu0 %v389_v0, %s515_s10  ;;  %19 = vrot.lane.b32.xlu1 %v391_v1, %s516_s11  ;;  %v392_v3 = vld [vmem:[%s783_s0 + $0x3c] sm:$0x1]   ;;  %s517_s16 = smov 124   ;;  %s518_s17 = smov 120   ;;  %v393_v4 = vld [vmem:[%s783_s0 + $0x3b] sm:$0x1]  }
   0x3   :  { %v394_v5 = vld [vmem:[%s783_s0 + $0x3a] sm:$0x1]   ;;  %s519_s22 = smov 118   ;;  %s520_s23 = smov 116   ;;  %v395_v6 = vld [vmem:[%s783_s0 + $0x39] sm:$0x1]  }
   0x4   :  { %v396_v7 = vld [vmem:[%s783_s0 + $0x38] sm:$0x1]   ;;  %s521_s28 = smov 114   ;;  %s522_s29 = smov 112   ;;  %v397_v8 = vld [vmem:[%s783_s0 + $0x37] sm:$0x1]  }
   0x5   :  { %v398_v9 = vld [vmem:[%s783_s0 + $0x36] sm:$0x1]   ;;  %s523_s5 = smov 110   ;;  %s524_s6 = smov 108   ;;  %v399_v10 = vld [vmem:[%s783_s0 + $0x35] sm:$0x1]  }
   0x6   :  { %13 = vrot.lane.b32.xlu0 %v390_v2, %s517_s16  ;;  %25 = vrot.lane.b32.xlu1 %v392_v3, %s518_s17  ;;  %v400_v11 = vld [vmem:[%s783_s0 + $0x34] sm:$0x1]   ;;  %s525_s11 = smov 106   ;;  %s526_s12 = smov 104   ;;  %v401_v12 = vld [vmem:[%s783_s0 + $0x33] sm:$0x1]  }
   0x7   :  { %v402_v13 = vld [vmem:[%s783_s0 + $0x32] sm:$0x1]   ;;  %s527_s17 = smov 102   ;;  %s528_s18 = smov 100   ;;  %v403_v14 = vld [vmem:[%s783_s0 + $0x31] sm:$0x1]  }
   0x8   :  { %v404_v15 = vld [vmem:[%s783_s0 + $0x30] sm:$0x1]   ;;  %v2_v16 = vld [vmem:[%s783_s0] sm:$0x1]   ;;  %s529_s25 = smov 98   ;;  %s530_s26 = smov 96  }
   0x9   :  { %v405_v17 = vld [vmem:[%s783_s0 + $0x2f] sm:$0x1]   ;;  %v406_v18 = vld [vmem:[%s783_s0 + $0x2e] sm:$0x1]   ;;  %4 = vst.msk [vmem:[#allocation0] sm:$0x1] %vm3_vm0, %v2_v16  }
   0xa   :  { %31 = vrot.lane.b32.xlu0 %v393_v4, %s519_s22  ;;  %37 = vrot.lane.b32.xlu1 %v394_v5, %s520_s23  ;;  %s531_s2 = smov 94   ;;  %s532_s3 = smov 92   ;;  %v407_v19 = vld [vmem:[%s783_s0 + $0x2d] sm:$0x1]   ;;  %v408_v20 = vld [vmem:[%s783_s0 + $0x2c] sm:$0x1]  }
   0xb   :  { %s533_s8 = smov 90   ;;  %s534_s9 = smov 88   ;;  %v409_v21 = vld [vmem:[%s783_s0 + $0x2b] sm:$0x1]   ;;  %v410_v22 = vld [vmem:[%s783_s0 + $0x2a] sm:$0x1]  }
   0xc   :  { %s535_s14 = smov 86   ;;  %s536_s15 = smov 84   ;;  %v411_v23 = vld [vmem:[%s783_s0 + $0x29] sm:$0x1]   ;;  %v412_v24 = vld [vmem:[%s783_s0 + $0x28] sm:$0x1]  }
   0xd   :  { %s537_s20 = smov 82   ;;  %s538_s21 = smov 80   ;;  %v413_v25 = vld [vmem:[%s783_s0 + $0x27] sm:$0x1]   ;;  %v414_v26 = vld [vmem:[%s783_s0 + $0x26] sm:$0x1]  }
   0xe   :  { %43 = vrot.lane.b32.xlu0 %v395_v6, %s521_s28  ;;  %49 = vrot.lane.b32.xlu1 %v396_v7, %s522_s29  ;;  %s540_s27 = smov 76   ;;  %v415_v27 = vld [vmem:[%s783_s0 + $0x25] sm:$0x1]   ;;  %v416_v28 = vld [vmem:[%s783_s0 + $0x24] sm:$0x1]   ;;  %s542_s4 = smov 72  }
   0xf   :  { %v417_v29 = vld [vmem:[%s783_s0 + $0x23] sm:$0x1]   ;;  %v418_v30 = vld [vmem:[%s783_s0 + $0x22] sm:$0x1]   ;;  %s544_s10 = smov 68   ;;  %s546_s16 = smov 64  }
  0x10   :  { %v419_v31 = vld [vmem:[%s783_s0 + $0x21] sm:$0x1]   ;;  %v420_v32 = vld [vmem:[%s783_s0 + $0x20] sm:$0x1]   ;;  %v421_v33 = vld [vmem:[%s783_s0 + $0x1f] sm:$0x1]  }
  0x11   :  { %v422_v34 = vld [vmem:[%s783_s0 + $0x1e] sm:$0x1]   ;;  %s548_s22 = smov 60   ;;  %v423_v35 = vld [vmem:[%s783_s0 + $0x1d] sm:$0x1]   ;;  %s550_s28 = smov 56  }
  0x12   :  { %55 = vrot.lane.b32.xlu0 %v397_v8, %s523_s5  ;;  %61 = vrot.lane.b32.xlu1 %v398_v9, %s524_s6  ;;  %v424_v36 = vld [vmem:[%s783_s0 + $0x1c] sm:$0x1]   ;;  %v425_v37 = vld [vmem:[%s783_s0 + $0x1b] sm:$0x1]   ;;  %s552_s5 = smov 52   ;;  %s558_s23 = smov 40  }
  0x13   :  { %v426_v38 = vld [vmem:[%s783_s0 + $0x1a] sm:$0x1]   ;;  %v427_v39 = vld [vmem:[%s783_s0 + $0x19] sm:$0x1]   ;;  %v428_v40 = vld [vmem:[%s783_s0 + $0x18] sm:$0x1]  }
  0x14   :  { %v429_v41 = vld [vmem:[%s783_s0 + $0x17] sm:$0x1]   ;;  %v430_v42 = vld [vmem:[%s783_s0 + $0x16] sm:$0x1]   ;;  %v431_v43 = vld [vmem:[%s783_s0 + $0x15] sm:$0x1]  }
  0x15   :  { %v432_v44 = vld [vmem:[%s783_s0 + $0x14] sm:$0x1]   ;;  %v433_v45 = vld [vmem:[%s783_s0 + $0x13] sm:$0x1]   ;;  %v434_v46 = vld [vmem:[%s783_s0 + $0x12] sm:$0x1]  }
  0x16   :  { %67 = vrot.lane.b32.xlu0 %v399_v10, %s525_s11  ;;  %73 = vrot.lane.b32.xlu1 %v400_v11, %s526_s12  ;;  %s554_s11 = smov 48   ;;  %s560_s29 = smov 36   ;;  %v435_v47 = vld [vmem:[%s783_s0 + $0x11] sm:$0x1]   ;;  %v436_v48 = vld [vmem:[%s783_s0 + $0x10] sm:$0x1]  }
  0x17   :  { %s562_s6 = smov 32   ;;  %v437_v49 = vld [vmem:[%s783_s0 + $0xf] sm:$0x1]   ;;  %v438_v50 = vld [vmem:[%s783_s0 + $0xe] sm:$0x1]   ;;  %s564_s12 = smov 28  }
  0x18   :  { %v439_v51 = vld [vmem:[%s783_s0 + $0xd] sm:$0x1]   ;;  %v440_v52 = vld [vmem:[%s783_s0 + $0xc] sm:$0x1]   ;;  %v441_v53 = vld [vmem:[%s783_s0 + $0xb] sm:$0x1]  }
  0x19   :  { %v442_v54 = vld [vmem:[%s783_s0 + $0xa] sm:$0x1]   ;;  %s568_s24 = smov 20   ;;  %v443_v55 = vld [vmem:[%s783_s0 + $0x9] sm:$0x1]   ;;  %s570_s30 = smov 16  }
  0x1a   :  { %79 = vrot.lane.b32.xlu0 %v401_v12, %s527_s17  ;;  %85 = vrot.lane.b32.xlu1 %v402_v13, %s528_s18  ;;  %s556_s17 = smov 44   ;;  %s566_s18 = smov 24   ;;  %v444_v56 = vld [vmem:[%s783_s0 + $0x8] sm:$0x1]   ;;  %v445_v57 = vld [vmem:[%s783_s0 + $0x7] sm:$0x1]  }
  0x1b   :  { %v446_v58 = vld [vmem:[%s783_s0 + $0x6] sm:$0x1]   ;;  %s572_s7 = smov 12   ;;  %v447_v59 = vld [vmem:[%s783_s0 + $0x5] sm:$0x1]   ;;  %s574_s13 = smov 8  }
  0x1c   :  { %v448_v60 = vld [vmem:[%s783_s0 + $0x4] sm:$0x1]   ;;  %v449_v63 = vld [vmem:[%s783_s0 + $0x3] sm:$0x1]   ;;  %v450_v0 = vld [vmem:[%s783_s0 + $0x2] sm:$0x1]  }
  0x1d   :  { %vm27_vm4 = vcmask 999360   ;;  %vm33_vm5 = vcmask 982960   ;;  %s576_s19 = smov 4   ;;  %v451_v3 = vld [vmem:[%s783_s0 + $0x1] sm:$0x1]   ;;  %vm39_vm6 = vcmask 966560  }
  0x1e   :  { %91 = vrot.lane.b32.xlu0 %v403_v14, %s529_s25  ;;  %97 = vrot.lane.b32.xlu1 %v404_v15, %s530_s26  ;;  %s539_s26 = smov 78   ;;  %s577_s0 = smov 2   ;;  %vm45_vm7 = vcmask 950160   ;;  %vm51_vm8 = vcmask 933760   ;;  %vm57_vm9 = vcmask 917360   ;;  %vm63_vm10 = vcmask 900960  }
  0x1f   :  { %vm69_vm11 = vcmask 884560   ;;  %vm75_vm12 = vcmask 868160   ;;  %vm81_vm13 = vcmask 851760   ;;  %vm87_vm14 = vcmask 835360  }
  0x20   :  { %vm93_vm15 = vcmask 818960   ;;  %vm99_vm0 = vcmask 802560  }
  0x22   :  { %103 = vrot.lane.b32.xlu0 %v405_v17, %s531_s2  ;;  %109 = vrot.lane.b32.xlu1 %v406_v18, %s532_s3  ;;  %s541_s3 = smov 74  }
  0x26   :  { %115 = vrot.lane.b32.xlu0 %v407_v19, %s533_s8  ;;  %121 = vrot.lane.b32.xlu1 %v408_v20, %s534_s9  ;;  %s543_s9 = smov 70  }
  0x2a   :  { %127 = vrot.lane.b32.xlu0 %v409_v21, %s535_s14  ;;  %133 = vrot.lane.b32.xlu1 %v410_v22, %s536_s15  ;;  %s545_s15 = smov 66  }
  0x2e   :  { %139 = vrot.lane.b32.xlu0 %v411_v23, %s537_s20  ;;  %145 = vrot.lane.b32.xlu1 %v412_v24, %s538_s21  ;;  %s547_s21 = smov 62  }
  0x32   :  { %151 = vrot.lane.b32.xlu0 %v413_v25, %s539_s26  ;;  %157 = vrot.lane.b32.xlu1 %v414_v26, %s540_s27  ;;  %s549_s27 = smov 58  }
  0x36   :  { %163 = vrot.lane.b32.xlu0 %v415_v27, %s541_s3  ;;  %169 = vrot.lane.b32.xlu1 %v416_v28, %s542_s4  ;;  %s551_s4 = smov 54  }
  0x3a   :  { %175 = vrot.lane.b32.xlu0 %v417_v29, %s543_s9  ;;  %181 = vrot.lane.b32.xlu1 %v418_v30, %s544_s10  ;;  %s553_s10 = smov 50  }
  0x3e   :  { %187 = vrot.lane.b32.xlu0 %v419_v31, %s545_s15  ;;  %193 = vrot.lane.b32.xlu1 %v420_v32, %s546_s16  ;;  %s555_s16 = smov 46  }
  0x42   :  { %199 = vrot.lane.b32.xlu0 %v421_v33, %s547_s21  ;;  %205 = vrot.lane.b32.xlu1 %v422_v34, %s548_s22  ;;  %s557_s22 = smov 42  }
  0x46   :  { %211 = vrot.lane.b32.xlu0 %v423_v35, %s549_s27  ;;  %217 = vrot.lane.b32.xlu1 %v424_v36, %s550_s28  ;;  %s559_s28 = smov 38  }
  0x4a   :  { %223 = vrot.lane.b32.xlu0 %v425_v37, %s551_s4  ;;  %229 = vrot.lane.b32.xlu1 %v426_v38, %s552_s5  ;;  %s561_s5 = smov 34  }
  0x4e   :  { %235 = vrot.lane.b32.xlu0 %v427_v39, %s553_s10  ;;  %241 = vrot.lane.b32.xlu1 %v428_v40, %s554_s11  ;;  %s563_s11 = smov 30  }
  0x52   :  { %247 = vrot.lane.b32.xlu0 %v429_v41, %s555_s16  ;;  %253 = vrot.lane.b32.xlu1 %v430_v42, %s556_s17  ;;  %s565_s17 = smov 26  }
  0x56   :  { %259 = vrot.lane.b32.xlu0 %v431_v43, %s557_s22  ;;  %265 = vrot.lane.b32.xlu1 %v432_v44, %s558_s23  ;;  %s567_s23 = smov 22  }
  0x5a   :  { %271 = vrot.lane.b32.xlu0 %v433_v45, %s559_s28  ;;  %277 = vrot.lane.b32.xlu1 %v434_v46, %s560_s29  ;;  %s569_s29 = smov 18  }
  0x5e   :  { %283 = vrot.lane.b32.xlu0 %v435_v47, %s561_s5  ;;  %289 = vrot.lane.b32.xlu1 %v436_v48, %s562_s6  ;;  %s571_s6 = smov 14  }
  0x62   :  { %295 = vrot.lane.b32.xlu0 %v437_v49, %s563_s11  ;;  %301 = vrot.lane.b32.xlu1 %v438_v50, %s564_s12  ;;  %s573_s12 = smov 10  }
  0x66   :  { %307 = vrot.lane.b32.xlu0 %v439_v51, %s565_s17  ;;  %313 = vrot.lane.b32.xlu1 %v440_v52, %s566_s18  ;;  %s575_s18 = smov 6  }
  0x6a   :  { %319 = vrot.lane.b32.xlu0 %v441_v53, %s567_s23  ;;  %325 = vrot.lane.b32.xlu1 %v442_v54, %s568_s24 }
  0x6e   :  { %331 = vrot.lane.b32.xlu0 %v443_v55, %s569_s29  ;;  %337 = vrot.lane.b32.xlu1 %v444_v56, %s570_s30 }
  0x72   :  { %343 = vrot.lane.b32.xlu0 %v445_v57, %s571_s6  ;;  %349 = vrot.lane.b32.xlu1 %v446_v58, %s572_s7 }
  0x74   :  { %v8_v61 = vpop.permute.xlu0 %7   ;;  %v20_v62 = vpop.permute.xlu1 %19  }
  0x75   :  { %10 = vst.msk [vmem:[#allocation0] sm:$0x1] %vm9_vm1, %v8_v61   ;;  %vm105_vm1 = vcmask 786160  }
  0x76   :  { %355 = vrot.lane.b32.xlu0 %v447_v59, %s573_s12  ;;  %361 = vrot.lane.b32.xlu1 %v448_v60, %s574_s13 }
  0x78   :  { %v14_v1 = vpop.permute.xlu0 %13   ;;  %v26_v2 = vpop.permute.xlu1 %25  }
  0x79   :  { %16 = vst.msk [vmem:[#allocation0] sm:$0x1] %vm15_vm3, %v14_v1   ;;  %vm117_vm3 = vcmask 753360  }
  0x7a   :  { %22 = vst.msk [vmem:[#allocation0] sm:$0x1] %vm21_vm2, %v20_v62   ;;  %367 = vrot.lane.b32.xlu0 %v449_v63, %s575_s18  ;;  %373 = vrot.lane.b32.xlu1 %v450_v0, %s576_s19  ;;  %vm111_vm2 = vcmask 769760  }
  0x7b   :  { %28 = vst.msk [vmem:[#allocation0] sm:$0x1] %vm27_vm4, %v26_v2   ;;  %vm123_vm4 = vcmask 736960  }
  0x7c   :  { %v32_v4 = vpop.permute.xlu0 %31   ;;  %v38_v5 = vpop.permute.xlu1 %37  }
  0x7d   :  { %34 = vst.msk [vmem:[#allocation0] sm:$0x1] %vm33_vm5, %v32_v4   ;;  %vm129_vm5 = vcmask 720560  }
  0x7e   :  { %379 = vrot.lane.b32.xlu0 %v451_v3, %s577_s0  ;;  %40 = vst.msk [vmem:[#allocation0] sm:$0x1] %vm39_vm6, %v38_v5   ;;  %vm135_vm6 = vcmask 704160  }
  0x80   :  { %v44_v6 = vpop.permute.xlu0 %43   ;;  %v50_v7 = vpop.permute.xlu1 %49  }
  0x81   :  { %46 = vst.msk [vmem:[#allocation0] sm:$0x1] %vm45_vm7, %v44_v6   ;;  %vm141_vm7 = vcmask 687760  }
  0x82   :  { %52 = vst.msk [vmem:[#allocation0] sm:$0x1] %vm51_vm8, %v50_v7   ;;  %vm147_vm8 = vcmask 671360  }
  0x84   :  { %v56_v8 = vpop.permute.xlu0 %55   ;;  %v62_v9 = vpop.permute.xlu1 %61  }
  0x85   :  { %58 = vst.msk [vmem:[#allocation0] sm:$0x1] %vm57_vm9, %v56_v8   ;;  %vm153_vm9 = vcmask 654960  }
  0x86   :  { %64 = vst.msk [vmem:[#allocation0] sm:$0x1] %vm63_vm10, %v62_v9   ;;  %vm159_vm10 = vcmask 638560  }
  0x88   :  { %v68_v10 = vpop.permute.xlu0 %67   ;;  %v74_v11 = vpop.permute.xlu1 %73  }
  0x89   :  { %70 = vst.msk [vmem:[#allocation0] sm:$0x1] %vm69_vm11, %v68_v10   ;;  %vm165_vm11 = vcmask 622160  }
  0x8a   :  { %76 = vst.msk [vmem:[#allocation0] sm:$0x1] %vm75_vm12, %v74_v11   ;;  %vm171_vm12 = vcmask 605760  }
  0x8c   :  { %v80_v12 = vpop.permute.xlu0 %79   ;;  %v86_v13 = vpop.permute.xlu1 %85  }
  0x8d   :  { %82 = vst.msk [vmem:[#allocation0] sm:$0x1] %vm81_vm13, %v80_v12   ;;  %vm177_vm13 = vcmask 589360  }
  0x8e   :  { %88 = vst.msk [vmem:[#allocation0] sm:$0x1] %vm87_vm14, %v86_v13   ;;  %vm183_vm14 = vcmask 572960  }
  0x90   :  { %v92_v14 = vpop.permute.xlu0 %91   ;;  %v98_v15 = vpop.permute.xlu1 %97  }
  0x91   :  { %94 = vst.msk [vmem:[#allocation0] sm:$0x1] %vm93_vm15, %v92_v14   ;;  %vm189_vm15 = vcmask 556560  }
  0x92   :  { %100 = vst.msk [vmem:[#allocation0] sm:$0x1] %vm99_vm0, %v98_v15   ;;  %vm195_vm0 = vcmask 540160  }
  0x94   :  { %v104_v16 = vpop.permute.xlu0 %103   ;;  %v110_v17 = vpop.permute.xlu1 %109  }
  0x95   :  { %106 = vst.msk [vmem:[#allocation0] sm:$0x1] %vm105_vm1, %v104_v16   ;;  %vm201_vm1 = vcmask 523760  }
  0x96   :  { %112 = vst.msk [vmem:[#allocation0] sm:$0x1] %vm111_vm2, %v110_v17   ;;  %vm207_vm2 = vcmask 507360  }
  0x98   :  { %v116_v18 = vpop.permute.xlu0 %115   ;;  %v122_v19 = vpop.permute.xlu1 %121  }
  0x99   :  { %118 = vst.msk [vmem:[#allocation0] sm:$0x1] %vm117_vm3, %v116_v18   ;;  %vm213_vm3 = vcmask 490960  }
  0x9a   :  { %124 = vst.msk [vmem:[#allocation0] sm:$0x1] %vm123_vm4, %v122_v19   ;;  %vm219_vm4 = vcmask 474560  }
  0x9c   :  { %v128_v20 = vpop.permute.xlu0 %127   ;;  %v134_v21 = vpop.permute.xlu1 %133  }
  0x9d   :  { %130 = vst.msk [vmem:[#allocation0] sm:$0x1] %vm129_vm5, %v128_v20   ;;  %vm225_vm5 = vcmask 458160  }
  0x9e   :  { %136 = vst.msk [vmem:[#allocation0] sm:$0x1] %vm135_vm6, %v134_v21   ;;  %vm231_vm6 = vcmask 441760  }
  0xa0   :  { %v140_v22 = vpop.permute.xlu0 %139   ;;  %v146_v23 = vpop.permute.xlu1 %145  }
  0xa1   :  { %142 = vst.msk [vmem:[#allocation0] sm:$0x1] %vm141_vm7, %v140_v22   ;;  %vm237_vm7 = vcmask 425360  }
  0xa2   :  { %148 = vst.msk [vmem:[#allocation0] sm:$0x1] %vm147_vm8, %v146_v23   ;;  %vm243_vm8 = vcmask 408960  }
  0xa4   :  { %v152_v24 = vpop.permute.xlu0 %151   ;;  %v158_v25 = vpop.permute.xlu1 %157  }
  0xa5   :  { %154 = vst.msk [vmem:[#allocation0] sm:$0x1] %vm153_vm9, %v152_v24   ;;  %vm249_vm9 = vcmask 392560  }
  0xa6   :  { %160 = vst.msk [vmem:[#allocation0] sm:$0x1] %vm159_vm10, %v158_v25   ;;  %vm255_vm10 = vcmask 376160  }
  0xa8   :  { %v164_v26 = vpop.permute.xlu0 %163   ;;  %v170_v27 = vpop.permute.xlu1 %169  }
  0xa9   :  { %166 = vst.msk [vmem:[#allocation0] sm:$0x1] %vm165_vm11, %v164_v26   ;;  %vm261_vm11 = vcmask 359760  }
  0xaa   :  { %172 = vst.msk [vmem:[#allocation0] sm:$0x1] %vm171_vm12, %v170_v27   ;;  %vm267_vm12 = vcmask 343360  }
  0xac   :  { %v176_v28 = vpop.permute.xlu0 %175   ;;  %v182_v29 = vpop.permute.xlu1 %181  }
  0xad   :  { %178 = vst.msk [vmem:[#allocation0] sm:$0x1] %vm177_vm13, %v176_v28   ;;  %vm273_vm13 = vcmask 326960  }
  0xae   :  { %184 = vst.msk [vmem:[#allocation0] sm:$0x1] %vm183_vm14, %v182_v29   ;;  %vm279_vm14 = vcmask 310560  }
  0xb0   :  { %v188_v30 = vpop.permute.xlu0 %187   ;;  %v194_v31 = vpop.permute.xlu1 %193  }
  0xb1   :  { %190 = vst.msk [vmem:[#allocation0] sm:$0x1] %vm189_vm15, %v188_v30   ;;  %vm285_vm15 = vcmask 294160  }
  0xb2   :  { %196 = vst.msk [vmem:[#allocation0] sm:$0x1] %vm195_vm0, %v194_v31   ;;  %vm291_vm0 = vcmask 277760  }
  0xb4   :  { %v200_v32 = vpop.permute.xlu0 %199   ;;  %v206_v33 = vpop.permute.xlu1 %205  }
  0xb5   :  { %202 = vst.msk [vmem:[#allocation0] sm:$0x1] %vm201_vm1, %v200_v32   ;;  %vm297_vm1 = vcmask 261360  }
  0xb6   :  { %208 = vst.msk [vmem:[#allocation0] sm:$0x1] %vm207_vm2, %v206_v33   ;;  %vm303_vm2 = vcmask 244960  }
  0xb8   :  { %v212_v34 = vpop.permute.xlu0 %211   ;;  %v218_v35 = vpop.permute.xlu1 %217  }
  0xb9   :  { %214 = vst.msk [vmem:[#allocation0] sm:$0x1] %vm213_vm3, %v212_v34   ;;  %vm309_vm3 = vcmask 228560  }
  0xba   :  { %220 = vst.msk [vmem:[#allocation0] sm:$0x1] %vm219_vm4, %v218_v35   ;;  %vm315_vm4 = vcmask 212160  }
  0xbc   :  { %v224_v36 = vpop.permute.xlu0 %223   ;;  %v230_v37 = vpop.permute.xlu1 %229  }
  0xbd   :  { %226 = vst.msk [vmem:[#allocation0] sm:$0x1] %vm225_vm5, %v224_v36   ;;  %vm321_vm5 = vcmask 195760  }
  0xbe   :  { %232 = vst.msk [vmem:[#allocation0] sm:$0x1] %vm231_vm6, %v230_v37   ;;  %vm327_vm6 = vcmask 179360  }
  0xc0   :  { %v236_v38 = vpop.permute.xlu0 %235   ;;  %v242_v39 = vpop.permute.xlu1 %241  }
  0xc1   :  { %238 = vst.msk [vmem:[#allocation0] sm:$0x1] %vm237_vm7, %v236_v38   ;;  %vm333_vm7 = vcmask 162960  }
  0xc2   :  { %244 = vst.msk [vmem:[#allocation0] sm:$0x1] %vm243_vm8, %v242_v39   ;;  %vm339_vm8 = vcmask 146560  }
  0xc4   :  { %v248_v40 = vpop.permute.xlu0 %247   ;;  %v254_v41 = vpop.permute.xlu1 %253  }
  0xc5   :  { %250 = vst.msk [vmem:[#allocation0] sm:$0x1] %vm249_vm9, %v248_v40   ;;  %vm345_vm9 = vcmask 130160  }
  0xc6   :  { %256 = vst.msk [vmem:[#allocation0] sm:$0x1] %vm255_vm10, %v254_v41   ;;  %vm351_vm10 = vcmask 113760  }
  0xc8   :  { %v260_v42 = vpop.permute.xlu0 %259   ;;  %v266_v43 = vpop.permute.xlu1 %265  }
  0xc9   :  { %262 = vst.msk [vmem:[#allocation0] sm:$0x1] %vm261_vm11, %v260_v42   ;;  %vm357_vm11 = vcmask 97360  }
  0xca   :  { %268 = vst.msk [vmem:[#allocation0] sm:$0x1] %vm267_vm12, %v266_v43   ;;  %vm363_vm12 = vcmask 80960  }
  0xcc   :  { %v272_v44 = vpop.permute.xlu0 %271   ;;  %v278_v45 = vpop.permute.xlu1 %277  }
  0xcd   :  { %274 = vst.msk [vmem:[#allocation0] sm:$0x1] %vm273_vm13, %v272_v44   ;;  %vm369_vm13 = vcmask 64560  }
  0xce   :  { %280 = vst.msk [vmem:[#allocation0] sm:$0x1] %vm279_vm14, %v278_v45   ;;  %vm375_vm14 = vcmask 48160  }
  0xd0   :  { %v284_v46 = vpop.permute.xlu0 %283   ;;  %v290_v47 = vpop.permute.xlu1 %289  }
  0xd1   :  { %286 = vst.msk [vmem:[#allocation0] sm:$0x1] %vm285_vm15, %v284_v46   ;;  %vm381_vm15 = vcmask 31760  }
  0xd2   :  { %292 = vst.msk [vmem:[#allocation0] sm:$0x1] %vm291_vm0, %v290_v47  }
  0xd4   :  { %v296_v48 = vpop.permute.xlu0 %295   ;;  %v302_v49 = vpop.permute.xlu1 %301  }
  0xd5   :  { %298 = vst.msk [vmem:[#allocation0] sm:$0x1] %vm297_vm1, %v296_v48  }
  0xd6   :  { %304 = vst.msk [vmem:[#allocation0] sm:$0x1] %vm303_vm2, %v302_v49  }
  0xd8   :  { %v308_v50 = vpop.permute.xlu0 %307   ;;  %v314_v51 = vpop.permute.xlu1 %313  }
  0xd9   :  { %310 = vst.msk [vmem:[#allocation0] sm:$0x1] %vm309_vm3, %v308_v50  }
  0xda   :  { %316 = vst.msk [vmem:[#allocation0] sm:$0x1] %vm315_vm4, %v314_v51  }
  0xdc   :  { %v320_v52 = vpop.permute.xlu0 %319   ;;  %v326_v53 = vpop.permute.xlu1 %325  }
  0xdd   :  { %322 = vst.msk [vmem:[#allocation0] sm:$0x1] %vm321_vm5, %v320_v52  }
  0xde   :  { %328 = vst.msk [vmem:[#allocation0] sm:$0x1] %vm327_vm6, %v326_v53  }
  0xe0   :  { %v332_v54 = vpop.permute.xlu0 %331   ;;  %v338_v55 = vpop.permute.xlu1 %337  }
  0xe1   :  { %334 = vst.msk [vmem:[#allocation0] sm:$0x1] %vm333_vm7, %v332_v54  }
  0xe2   :  { %340 = vst.msk [vmem:[#allocation0] sm:$0x1] %vm339_vm8, %v338_v55  }
  0xe4   :  { %v344_v56 = vpop.permute.xlu0 %343   ;;  %v350_v57 = vpop.permute.xlu1 %349  }
  0xe5   :  { %346 = vst.msk [vmem:[#allocation0] sm:$0x1] %vm345_vm9, %v344_v56  }
  0xe6   :  { %352 = vst.msk [vmem:[#allocation0] sm:$0x1] %vm351_vm10, %v350_v57  }
  0xe8   :  { %v356_v58 = vpop.permute.xlu0 %355   ;;  %v362_v59 = vpop.permute.xlu1 %361  }
  0xe9   :  { %358 = vst.msk [vmem:[#allocation0] sm:$0x1] %vm357_vm11, %v356_v58  }
  0xea   :  { %364 = vst.msk [vmem:[#allocation0] sm:$0x1] %vm363_vm12, %v362_v59  }
  0xec   :  { %v368_v60 = vpop.permute.xlu0 %367   ;;  %v374_v61 = vpop.permute.xlu1 %373  }
  0xed   :  { %370 = vst.msk [vmem:[#allocation0] sm:$0x1] %vm369_vm13, %v368_v60  }
  0xee   :  { %376 = vst.msk [vmem:[#allocation0] sm:$0x1] %vm375_vm14, %v374_v61  }
  0xf0   :  { %v380_v62 = vpop.permute.xlu0 %379  }
  0xf1   :  { %382 = vst.msk [vmem:[#allocation0] sm:$0x1] %vm381_vm15, %v380_v62  }
  0xf8   :  { %v386_v63 = vld [vmem:[#allocation0] sm:$0x1] }
  0xf9   :  { %388 = vst [vmem:[%s784_s1] sm:$0x1] %v386_v63 }

// kernel: linear_pallas.1
= control target key start
LH: loop header
LB: loop body
LE: loop exit
PB: predicated region body
PF: predicated region fallthrough
CT: control target
= control target key end

     0   :  { %vm542_vm0 = vmmov 0   ;;  %s819_s1 = inlined_call_operand.vmem [shape: f32[640,128], index: 1, kind: input, shape index: {}]   ;;  %s820_s0 = inlined_call_operand.vmem [shape: f32[3,640], index: 0, kind: input, shape index: {}]   ;;  %s821_s2 = inlined_call_operand.vmem [shape: f32[1,128], index: 2, kind: input, shape index: {}]   ;;  %s822_s3 = inlined_call_operand.vmem [shape: f32[3,128], index: 3, kind: output, shape index: {}]  }
   0x1   :  { %v33_v0 = vld [vmem:[%s819_s1 + $0x80] sm:$0xff]  ;;  %v34_v1 = vld [vmem:[%s819_s1 + $0x88] sm:$0xff]  ;;  %v35_v11 = vld [vmem:[%s819_s1 + $0x90] sm:$0xff] }
   0x2   :  { %v17_v2 = vld [vmem:[%s819_s1] sm:$0xff]  ;;  %v448_v3 = vpack.c.bf16 %v34_v1, %v33_v0  ;;  %v18_v4 = vld [vmem:[%s819_s1 + $0x8] sm:$0xff]  ;;  %v36_v13 = vld [vmem:[%s819_s1 + $0x98] sm:$0xff] }
   0x3   :  { %v65_v5 = vld [vmem:[%s819_s1 + $0x180] sm:$0xff]  ;;  %v66_v6 = vld [vmem:[%s819_s1 + $0x188] sm:$0xff]  ;;  %v450_v7 = vpack.c.bf16 %v18_v4, %v17_v2  ;;  %v19_v14 = vld [vmem:[%s819_s1 + $0x10] sm:$0xff]  ;;  %v452_v16 = vpack.c.bf16 %v36_v13, %v35_v11 }
   0x4   :  { %v480_v8 = vpack.c.bf16 %v66_v6, %v65_v5  ;;  %v49_v9 = vld [vmem:[%s819_s1 + $0x100] sm:$0xff]  ;;  %v50_v10 = vld [vmem:[%s819_s1 + $0x108] sm:$0xff]  ;;  %449 = vmatprep.subr.bf16.mxu0 %v448_v3  ;;  %v20_v15 = vld [vmem:[%s819_s1 + $0x18] sm:$0xff] }
   0x5   :  { %v482_v12 = vpack.c.bf16 %v50_v10, %v49_v9  ;;  %451 = vmatpush3.bf16.msra.mxu0 %v450_v7  ;;  %v454_v17 = vpack.c.bf16 %v20_v15, %v19_v14  ;;  %v67_v18 = vld [vmem:[%s819_s1 + $0x190] sm:$0xff]  ;;  %v68_v19 = vld [vmem:[%s819_s1 + $0x198] sm:$0xff]  ;;  %v37_v23 = vld [vmem:[%s819_s1 + $0xa0] sm:$0xff] }
   0x6   :  { %481 = vmatprep.subr.bf16.mxu1 %v480_v8  ;;  %v51_v20 = vld [vmem:[%s819_s1 + $0x110] sm:$0xff]  ;;  %v484_v21 = vpack.c.bf16 %v68_v19, %v67_v18  ;;  %v52_v22 = vld [vmem:[%s819_s1 + $0x118] sm:$0xff]  ;;  %v38_v24 = vld [vmem:[%s819_s1 + $0xa8] sm:$0xff]  ;;  %453 = vmatprep.subr.bf16.mxu0 %v452_v16 }
   0x7   :  { %483 = vmatpush3.bf16.msra.mxu1 %v482_v12  ;;  %v486_v25 = vpack.c.bf16 %v52_v22, %v51_v20  ;;  %v456_v26 = vpack.c.bf16 %v38_v24, %v37_v23  ;;  %v21_v27 = vld [vmem:[%s819_s1 + $0x20] sm:$0xff]  ;;  %v22_v28 = vld [vmem:[%s819_s1 + $0x28] sm:$0xff]  ;;  %v39_v35 = vld [vmem:[%s819_s1 + $0xb0] sm:$0xff] }
   0x8   :  { %v69_v29 = vld [vmem:[%s819_s1 + $0x1a0] sm:$0xff]  ;;  %485 = vmatprep.subr.bf16.mxu1 %v484_v21  ;;  %v70_v30 = vld [vmem:[%s819_s1 + $0x1a8] sm:$0xff]  ;;  %v458_v33 = vpack.c.bf16 %v22_v28, %v21_v27  ;;  %v40_v36 = vld [vmem:[%s819_s1 + $0xb8] sm:$0xff] }
   0x9   :  { %v53_v31 = vld [vmem:[%s819_s1 + $0x120] sm:$0xff]  ;;  %v54_v32 = vld [vmem:[%s819_s1 + $0x128] sm:$0xff]  ;;  %455 = vmatpush3.bf16.msra.mxu0 %v454_v17  ;;  %v488_v34 = vpack.c.bf16 %v70_v30, %v69_v29  ;;  %v23_v37 = vld [vmem:[%s819_s1 + $0x30] sm:$0xff]  ;;  %v460_v39 = vpack.c.bf16 %v40_v36, %v39_v35 }
   0xa   :  { %457 = vmatprep.subr.bf16.mxu0 %v456_v26  ;;  %v490_v38 = vpack.c.bf16 %v54_v32, %v53_v31  ;;  %v24_v40 = vld [vmem:[%s819_s1 + $0x38] sm:$0xff]  ;;  %v71_v41 = vld [vmem:[%s819_s1 + $0x1b0] sm:$0xff]  ;;  %v41_v46 = vld [vmem:[%s819_s1 + $0xc0] sm:$0xff] }
   0xb   :  { %487 = vmatpush3.bf16.msra.mxu1 %v486_v25  ;;  %v72_v42 = vld [vmem:[%s819_s1 + $0x1b8] sm:$0xff]  ;;  %v55_v44 = vld [vmem:[%s819_s1 + $0x130] sm:$0xff]  ;;  %v42_v47 = vld [vmem:[%s819_s1 + $0xc8] sm:$0xff]  ;;  %v462_v48 = vpack.c.bf16 %v24_v40, %v23_v37 }
   0xc   :  { %489 = vmatprep.subr.bf16.mxu1 %v488_v34  ;;  %v492_v43 = vpack.c.bf16 %v72_v42, %v71_v41  ;;  %v56_v45 = vld [vmem:[%s819_s1 + $0x138] sm:$0xff]  ;;  %v73_v49 = vld [vmem:[%s819_s1 + $0x1c0] sm:$0xff]  ;;  %v74_v50 = vld [vmem:[%s819_s1 + $0x1c8] sm:$0xff]  ;;  %v464_v52 = vpack.c.bf16 %v42_v47, %v41_v46 }
   0xd   :  { %459 = vmatpush3.bf16.msra.mxu0 %v458_v33  ;;  %v494_v51 = vpack.c.bf16 %v56_v45, %v55_v44  ;;  %v25_v53 = vld [vmem:[%s819_s1 + $0x40] sm:$0xff]  ;;  %v26_v54 = vld [vmem:[%s819_s1 + $0x48] sm:$0xff]  ;;  %v496_v56 = vpack.c.bf16 %v74_v50, %v73_v49  ;;  %v43_v58 = vld [vmem:[%s819_s1 + $0xd0] sm:$0xff]  ;;  %v543_v45 = vmov 0.0  }
   0xe   :  { %461 = vmatprep.subr.bf16.mxu0 %v460_v39  ;;  %v57_v55 = vld [vmem:[%s819_s1 + $0x140] sm:$0xff]  ;;  %v58_v57 = vld [vmem:[%s819_s1 + $0x148] sm:$0xff]  ;;  %v44_v59 = vld [vmem:[%s819_s1 + $0xd8] sm:$0xff]  ;;  %v466_v62 = vpack.c.bf16 %v26_v54, %v25_v53  ;;  %v541_v39 = vmov 0.0|0.0  }
   0xf   :  { %491 = vmatpush3.bf16.msra.mxu1 %v490_v38  ;;  %v75_v60 = vld [vmem:[%s819_s1 + $0x1d0] sm:$0xff]  ;;  %v76_v61 = vld [vmem:[%s819_s1 + $0x1d8] sm:$0xff]  ;;  %v498_v63 = vpack.c.bf16 %v58_v57, %v57_v55  ;;  %v468_v0 = vpack.c.bf16 %v44_v59, %v43_v58  ;;  %v45_v6 = vld [vmem:[%s819_s1 + $0xe0] sm:$0xff] }
  0x10   :  { %493 = vmatprep.subr.bf16.mxu1 %v492_v43  ;;  %v27_v1 = vld [vmem:[%s819_s1 + $0x50] sm:$0xff]  ;;  %v28_v2 = vld [vmem:[%s819_s1 + $0x58] sm:$0xff]  ;;  %v500_v4 = vpack.c.bf16 %v76_v61, %v75_v60  ;;  %v46_v7 = vld [vmem:[%s819_s1 + $0xe8] sm:$0xff] }
  0x11   :  { %463 = vmatpush3.bf16.msra.mxu0 %v462_v48  ;;  %v59_v3 = vld [vmem:[%s819_s1 + $0x150] sm:$0xff]  ;;  %v60_v5 = vld [vmem:[%s819_s1 + $0x158] sm:$0xff]  ;;  %v77_v8 = vld [vmem:[%s819_s1 + $0x1e0] sm:$0xff]  ;;  %v470_v10 = vpack.c.bf16 %v28_v2, %v27_v1  ;;  %v472_v14 = vpack.c.bf16 %v46_v7, %v45_v6 }
  0x12   :  { %465 = vmatprep.subr.bf16.mxu0 %v464_v52  ;;  %v78_v9 = vld [vmem:[%s819_s1 + $0x1e8] sm:$0xff]  ;;  %v29_v11 = vld [vmem:[%s819_s1 + $0x60] sm:$0xff]  ;;  %v502_v13 = vpack.c.bf16 %v60_v5, %v59_v3  ;;  %v47_v21 = vld [vmem:[%s819_s1 + $0xf0] sm:$0xff] }
  0x13   :  { %495 = vmatpush3.bf16.msra.mxu1 %v494_v51  ;;  %v14_v12 = vld [vmem:[%s820_s0] sm:$0x77]  ;;  %v30_v15 = vld [vmem:[%s819_s1 + $0x68] sm:$0xff]  ;;  %v504_v19 = vpack.c.bf16 %v78_v9, %v77_v8  ;;  %v48_v22 = vld [vmem:[%s819_s1 + $0xf8] sm:$0xff] }
  0x14   :  { %497 = vmatprep.subr.bf16.mxu1 %v496_v56  ;;  %v61_v16 = vld [vmem:[%s819_s1 + $0x160] sm:$0xff]  ;;  %v106_v17 = vcombine.high %v14_v12, %v14_v12  ;;  %v15_v18 = vld [vmem:[%s820_s0 + $0x8] sm:$0x77]  ;;  %v79_v24 = vld [vmem:[%s819_s1 + $0x1f0] sm:$0xff]  ;;  %v474_v26 = vpack.c.bf16 %v30_v15, %v29_v11  ;;  %v476_v28 = vpack.c.bf16 %v48_v22, %v47_v21 }
  0x15   :  { %467 = vmatpush3.bf16.msra.mxu0 %v466_v62  ;;  %v62_v20 = vld [vmem:[%s819_s1 + $0x168] sm:$0xff]  ;;  %v107_v23 = vcombine.high %v15_v18, %v15_v18  ;;  %v80_v25 = vld [vmem:[%s819_s1 + $0x1f8] sm:$0xff]  ;;  %v31_v29 = vld [vmem:[%s819_s1 + $0x70] sm:$0xff] }
  0x16   :  { %469 = vmatprep.subr.bf16.mxu0 %v468_v0  ;;  %174 = vmatprep.mubr.f32.mxu0 %v106_v17  ;;  %v506_v27 = vpack.c.bf16 %v62_v20, %v61_v16  ;;  %v32_v30 = vld [vmem:[%s819_s1 + $0x78] sm:$0xff]  ;;  %v508_v31 = vpack.c.bf16 %v80_v25, %v79_v24  ;;  %v63_v32 = vld [vmem:[%s819_s1 + $0x170] sm:$0xff]  ;;  %v81_v36 = vld [vmem:[%s819_s1 + $0x200] sm:$0xff] }
  0x17   :  { %499 = vmatpush3.bf16.msra.mxu1 %v498_v63  ;;  %244 = vmatprep.mubr.f32.mxu1 %v107_v23  ;;  %v64_v33 = vld [vmem:[%s819_s1 + $0x178] sm:$0xff]  ;;  %v478_v34 = vpack.c.bf16 %v32_v30, %v31_v29  ;;  %v82_v37 = vld [vmem:[%s819_s1 + $0x208] sm:$0xff]  ;;  %v83_v40 = vld [vmem:[%s819_s1 + $0x210] sm:$0xff] }
  0x18   :  { %501 = vmatprep.subr.bf16.mxu1 %v500_v4  ;;  %v510_v35 = vpack.c.bf16 %v64_v33, %v63_v32  ;;  %v513_v38 = vpack.c.bf16 %v82_v37, %v81_v36  ;;  %v84_v41 = vld [vmem:[%s819_s1 + $0x218] sm:$0xff]  ;;  %v85_v43 = vld [vmem:[%s819_s1 + $0x220] sm:$0xff]  ;;  %v86_v44 = vld [vmem:[%s819_s1 + $0x228] sm:$0xff] }
  0x19   :  { %471 = vmatpush3.bf16.msra.mxu0 %v470_v10  ;;  %v516_v42 = vpack.c.bf16 %v84_v41, %v83_v40  ;;  %v519_v46 = vpack.c.bf16 %v86_v44, %v85_v43  ;;  %v87_v47 = vld [vmem:[%s819_s1 + $0x230] sm:$0xff]  ;;  %v88_v48 = vld [vmem:[%s819_s1 + $0x238] sm:$0xff]  ;;  %v89_v50 = vld [vmem:[%s819_s1 + $0x240] sm:$0xff] }
  0x1a   :  { %473 = vmatprep.subr.bf16.mxu0 %v472_v14  ;;  %v522_v49 = vpack.c.bf16 %v88_v48, %v87_v47  ;;  %v90_v51 = vld [vmem:[%s819_s1 + $0x248] sm:$0xff]  ;;  %v91_v53 = vld [vmem:[%s819_s1 + $0x250] sm:$0xff]  ;;  %v92_v54 = vld [vmem:[%s819_s1 + $0x258] sm:$0xff] }
  0x1b   :  { %503 = vmatpush3.bf16.msra.mxu1 %v502_v13  ;;  %v525_v52 = vpack.c.bf16 %v90_v51, %v89_v50  ;;  %v528_v55 = vpack.c.bf16 %v92_v54, %v91_v53  ;;  %v93_v56 = vld [vmem:[%s819_s1 + $0x260] sm:$0xff]  ;;  %v94_v57 = vld [vmem:[%s819_s1 + $0x268] sm:$0xff]  ;;  %v95_v59 = vld [vmem:[%s819_s1 + $0x270] sm:$0xff] }
  0x1c   :  { %505 = vmatprep.subr.bf16.mxu1 %v504_v19  ;;  %v531_v58 = vpack.c.bf16 %v94_v57, %v93_v56  ;;  %v96_v60 = vld [vmem:[%s819_s1 + $0x278] sm:$0xff]  ;;  %v16_v62 = vld [vmem:[%s820_s0 + $0x10] sm:$0x7]  ;;  %v325_v0 = vld [vmem:[%s821_s2] ss:$0 sm:$0xff] }
  0x1d   :  { %475 = vmatpush3.bf16.msra.mxu0 %v474_v26  ;;  %v534_v61 = vpack.c.bf16 %v96_v60, %v95_v59 }
  0x1e   :  { %477 = vmatprep.subr.bf16.mxu0 %v476_v28 }
  0x1f   :  { %507 = vmatpush3.bf16.msra.mxu1 %v506_v27 }
  0x20   :  { %509 = vmatprep.subr.bf16.mxu1 %v508_v31 }
  0x21   :  { %479 = vmatpush3.bf16.msra.mxu0 %v478_v34 }
  0x22   :  { %512 = vmatprep.subr.bf16.mxu0 %v541_v39 }
  0x23   :  { %511 = vmatpush3.bf16.msra.mxu1 %v510_v35 }
  0x24   :  { %175 = vmatmul.mubr.f32.vlgmr.msra.gmra.mrb[0].mxu0 %v14_v12 }
  0x25   :  { %514 = vmatpush3.bf16.msra.mxu0 %v513_v38  ;;  %445 = vmatprep.mubr.msk.f32.mxu0 %vm542_vm0, %v543_v45 }
  0x26   :  { %245 = vmatmul.mubr.f32.vlgmr.msra.gmra.mrb[0].mxu1 %v15_v18  ;;  %515 = vmatprep.subr.bf16.mxu0 %v541_v39 }
  0x29   :  { %517 = vmatpush3.bf16.msra.mxu0 %v516_v42 }
  0x2a   :  { %518 = vmatprep.subr.bf16.mxu0 %v541_v39 }
  0x2d   :  { %520 = vmatpush3.bf16.msra.mxu0 %v519_v46 }
  0x2e   :  { %521 = vmatprep.subr.bf16.mxu0 %v541_v39 }
  0x31   :  { %523 = vmatpush3.bf16.msra.mxu0 %v522_v49 }
  0x32   :  { %524 = vmatprep.subr.bf16.mxu0 %v541_v39 }
  0x35   :  { %526 = vmatpush3.bf16.msra.mxu0 %v525_v52 }
  0x36   :  { %527 = vmatprep.subr.bf16.mxu0 %v541_v39 }
  0x39   :  { %529 = vmatpush3.bf16.msra.mxu0 %v528_v55 }
  0x3a   :  { %530 = vmatprep.subr.bf16.mxu0 %v541_v39 }
  0x3d   :  { %532 = vmatpush3.bf16.msra.mxu0 %v531_v58 }
  0x3e   :  { %533 = vmatprep.subr.bf16.mxu0 %v541_v39 }
  0x41   :  { %535 = vmatpush3.bf16.msra.mxu0 %v534_v61 }
  0x44   :  { %446 = vmatmul.mubr.f32.vlgmr.msra.gmra.mrb[2].mxu0 %v16_v62 }
  0xf7   :  { %v358_v63 = vpop.f32.mrb[0].mxu0 }
  0xf8   :  { %v359_v1 = vpop.f32.mrb[1].mxu0 }
  0xf9   :  { %v393_v2 = vpop.f32.mrb[0].mxu1  ;;  %v360_v3 = vadd.f32 %v359_v1, %v358_v63 }
  0xfa   :  { %v394_v4 = vpop.f32.mrb[1].mxu1 }
  0xfb   :  { %v395_v5 = vadd.f32 %v394_v4, %v393_v2  ;;  %v177_v6 = vadd.f32 %v360_v3, %v325_v0 }
  0xfd   :  { %v247_v7 = vadd.f32 %v395_v5, %v177_v6 }
 0x117   :  { %v316_v8 = vpop.f32.mrb[2].mxu0 }
 0x118   :  { %v317_v9 = vadd.f32 %v316_v8, %v247_v7  ;;  %v447_v10 = vpop.f32.mrb[3].mxu0 }
 0x11a   :  { %320 = vst [vmem:[%s822_s3] sm:$0x7] %v317_v9 }

</bundles_post_ra>
